<compile_context>
chip_gen: v5e
topology: v5e:2x2
jax: 0.10.0
libtpu: 0.0.40
codegen_flags: <defaults>
</compile_context>

<pallas_src>
import jax
import jax.numpy as jnp
from jax.experimental import pallas as pl
from jax.experimental.pallas import tpu as pltpu

EPS = 1e-10

_MIB = 1024 * 1024


def _l2norm_kernel(x_ref, w_ref, o_ref):
    # x_ref: (BN, C, TS)   w_ref: (C, 1)   o_ref: (BN, C, TS)
    x = x_ref[...].astype(jnp.float32)
    sq_sum = jnp.sum(x * x, axis=1, keepdims=True)            # (BN, 1, TS)
    norm = jnp.sqrt(sq_sum) + EPS                              # (BN, 1, TS)
    inv = 1.0 / norm                                           # exact; reused across C channels
    w = w_ref[...].astype(jnp.float32)[None, :, :]             # (1, C, 1)
    o_ref[...] = (x * inv * w).astype(o_ref.dtype)


def _vmem_budgets():
    """Per-generation VMEM sizing: (pipelined-block budget, scoped-VMEM limit)."""
    try:
        cap = pltpu.get_tpu_info().vmem_capacity_bytes
    except Exception:
        cap = 64 * _MIB  # conservative fallback sized for v7x
    # Leave >=16 MiB headroom for Mosaic internal scratch, the weight block and
    # the f32 temporaries the kernel materializes; cap at ~100 MiB on 128 MiB parts.
    limit = max(min(cap - 16 * _MIB, 100 * _MIB), 32 * _MIB)
    block_budget = min(limit // 3, 32 * _MIB)   # in+out blocks, double buffered
    return block_budget, limit


def _choose_spatial_tile(hw, c, itemsize, block_budget):
    """Largest lane tile (multiple of 128) that fits VMEM with tolerable edge waste."""
    hw_pad = -(-hw // 128) * 128
    for ts in (2048, 1024, 512, 256, 128):
        if ts > hw_pad:
            continue                                   # would be pure padding
        if 4 * c * ts * itemsize > block_budget:       # in+out, 2x buffered, bn=1
            continue
        waste = (-(-hw // ts)) * ts - hw               # compute-only edge waste
        if waste * 4 <= hw or ts == 128:
            return ts
    return 128


def _choose_batch_block(n, spatial_steps, per_batch_block_bytes, block_budget):
    """Pack batches per step only if >=4 grid steps remain (keeps both v7x TCs fed)."""
    for bn in (8, 4, 2):
        if (
            n % bn == 0
            and bn * per_batch_block_bytes <= block_budget
            and (n // bn) * spatial_steps >= 4
        ):
            return bn
    return 1


@jax.jit
def l2norm(x, weight):
    """x: (N, C, H, W), weight: (C,). Returns (N, C, H, W)."""
    n, c, h, w = x.shape
    hw = h * w

    block_budget, vmem_limit = _vmem_budgets()
    itemsize = jnp.dtype(x.dtype).itemsize
    ts = _choose_spatial_tile(hw, c, itemsize, block_budget)
    spatial_steps = pl.cdiv(hw, ts)
    bn = _choose_batch_block(n, spatial_steps, 4 * c * ts * itemsize, block_budget)

    x_flat = x.reshape(n, c, hw)        # contiguous view, free in XLA
    w_col = weight.reshape(c, 1)
    grid = (n // bn, spatial_steps)

    out_flat = pl.pallas_call(
        _l2norm_kernel,
        out_shape=jax.ShapeDtypeStruct((n, c, hw), x.dtype),
        grid_spec=pltpu.PrefetchScalarGridSpec(
            num_scalar_prefetch=0,
            grid=grid,
            in_specs=[
                pl.BlockSpec((bn, c, ts), lambda b, s: (b, 0, s)),
                pl.BlockSpec((c, 1), lambda b, s: (0, 0)),
            ],
            out_specs=pl.BlockSpec((bn, c, ts), lambda b, s: (b, 0, s)),
        ),
        compiler_params=pltpu.CompilerParams(
            dimension_semantics=("parallel", "parallel"),
            vmem_limit_bytes=vmem_limit,
        ),
    )(x_flat, w_col)

    return out_flat.reshape(n, c, h, w)


if __name__ == "__main__":
    # Module parameters (nn.init.constant_(weight, scale)).
    n_channels = 4
    scale = 20.0
    weight = jnp.full((n_channels,), scale, dtype=jnp.float32)

    # Small NCHW feature-map example.
    key = jax.random.PRNGKey(0)
    x = jax.random.normal(key, (2, n_channels, 16, 16), dtype=jnp.float32)

    out = l2norm(x, weight)
    jax.block_until_ready(out)

    # Reference check (same math as the PyTorch forward).
    norm = jnp.sqrt(jnp.sum(x * x, axis=1, keepdims=True)) + EPS
    ref = (x / norm) * weight[None, :, None, None]
    assert out.shape == x.shape and out.dtype == x.dtype
    assert jnp.allclose(out, ref, atol=1e-5, rtol=1e-5)

    print("KERNEL_OK")
</pallas_src>

<mosaic_0001>
module attributes {stable_mosaic.version = 11 : i64} {
  func.func @_l2norm_kernel(%arg0: i32, %arg1: i32, %arg2: memref<1x4x256xf32, #tpu.memory_space<vmem>>, %arg3: memref<4x1xf32, #tpu.memory_space<vmem>>, %arg4: memref<1x4x256xf32, #tpu.memory_space<vmem>>) attributes {dimension_semantics = [#tpu.dimension_semantics<parallel>, #tpu.dimension_semantics<parallel>], iteration_bounds = array<i64: 2, 1>, scalar_prefetch = 0 : i64, scratch_operands = 0 : i64, tpu.core_type = #tpu.core_type<tc>, window_params = [{transform_indices = @transform_0, window_bounds = array<i64: 1, 4, 256>}, {pipeline_mode = #tpu.pipeline_mode<synchronous>, transform_indices = @transform_1, window_bounds = array<i64: 4, 1>}, {transform_indices = @transform_2, window_bounds = array<i64: 1, 4, 256>}]} {
    %c0 = arith.constant 0 : index
    %c0_0 = arith.constant 0 : index
    %c0_1 = arith.constant 0 : index
    %0 = vector.load %arg2[%c0, %c0_0, %c0_1] : memref<1x4x256xf32, #tpu.memory_space<vmem>>, vector<1x4x256xf32>
    %1 = arith.mulf %0, %0 : vector<1x4x256xf32>
    %cst = arith.constant dense<0.000000e+00> : vector<1x256xf32>
    %2 = vector.multi_reduction <add>, %1, %cst [1] : vector<1x4x256xf32> to vector<1x256xf32>
    %3 = vector.shape_cast %2 : vector<1x256xf32> to vector<1x1x256xf32>
    %4 = math.sqrt %3 : vector<1x1x256xf32>
    %cst_2 = arith.constant 1.000000e-10 : f32
    %5 = vector.broadcast %cst_2 : f32 to vector<1x1x256xf32>
    %6 = arith.addf %4, %5 : vector<1x1x256xf32>
    %cst_3 = arith.constant 1.000000e+00 : f32
    %7 = vector.broadcast %cst_3 : f32 to vector<1x1x256xf32>
    %8 = arith.divf %7, %6 : vector<1x1x256xf32>
    %c0_4 = arith.constant 0 : index
    %c0_5 = arith.constant 0 : index
    %9 = vector.load %arg3[%c0_4, %c0_5] : memref<4x1xf32, #tpu.memory_space<vmem>>, vector<4x1xf32>
    %10 = vector.shape_cast %9 : vector<4x1xf32> to vector<1x4x1xf32>
    %11 = vector.broadcast %8 : vector<1x1x256xf32> to vector<1x4x256xf32>
    %12 = arith.mulf %0, %11 : vector<1x4x256xf32>
    %13 = vector.broadcast %10 : vector<1x4x1xf32> to vector<1x4x256xf32>
    %14 = arith.mulf %12, %13 : vector<1x4x256xf32>
    %c0_6 = arith.constant 0 : index
    %c0_7 = arith.constant 0 : index
    %c0_8 = arith.constant 0 : index
    %15 = vector.load %arg4[%c0_6, %c0_7, %c0_8] : memref<1x4x256xf32, #tpu.memory_space<vmem>>, vector<1x4x256xf32>
    tpu.vector_store %arg4[%c0_6, %c0_7, %c0_8], %14 {strides = array<i32>} : memref<1x4x256xf32, #tpu.memory_space<vmem>>, vector<1x4x256xf32>,
    return
  }
  func.func @transform_0(%arg0: i32, %arg1: i32) -> (i32, i32, i32) {
    %c0_i32 = arith.constant 0 : i32
    %c0_i32_0 = arith.constant 0 : i32
    return %arg0, %c0_i32, %arg1 : i32, i32, i32
  }
  func.func @transform_1(%arg0: i32, %arg1: i32) -> (i32, i32) {
    %c0_i32 = arith.constant 0 : i32
    %c0_i32_0 = arith.constant 0 : i32
    %c0_i32_1 = arith.constant 0 : i32
    return %c0_i32, %c0_i32_0 : i32, i32
  }
  func.func @transform_2(%arg0: i32, %arg1: i32) -> (i32, i32, i32) {
    %c0_i32 = arith.constant 0 : i32
    %c0_i32_0 = arith.constant 0 : i32
    return %arg0, %c0_i32, %arg1 : i32, i32, i32
  }
}

</mosaic_0001>

<bundles_post_ra>
// kernel: l2norm.1
= control target key start
LH: loop header
LB: loop body
LE: loop exit
PB: predicated region body
PF: predicated region fallthrough
CT: control target
= control target key end

     0   :  { %s456_s9 = smov 0   ;;  %s458_s10 = smov 0   ;;  %s507_s0 = inlined_call_operand.vmem [shape: f32[2,4,256], index: 0, kind: input, shape index: {}]   ;;  %s508_s1 = inlined_call_operand.vmem [shape: f32[4,1], index: 1, kind: input, shape index: {}]   ;;  %s509_s2 = inlined_call_operand.vmem [shape: f32[2,4,256], index: 2, kind: output, shape index: {}]  }
   0x1   :  { %s460_s11 = smov 0  }
   0x2 LB: > { %s24_s12 = sadd.s32 1, %s433_s10  ;;  %p371_p0 = scmp.ge.s32.totalorder %s437_s11, 1  ;;  %s437_s11 = sphi %s460_s11, %s12_s11   ;;  %s433_s10 = sphi %s458_s10, %s511_s10   ;;  %s429_s9 = sphi %s456_s9, %s510_s9  }
   0x3   : > { %p26_p1 = scmp.ge.s32.totalorder %s24_s12, 2  ;;  %p133_p2 = scmp.lt.s32.totalorder %s437_s11, 3 }
   0x5   : > { %s513_s12 = smov (%p26_p1, %s24_s12), 0  ;;  %p134_p3 = pnand %p371_p0, %p133_p2 }
   0x6   : > { %p164_p4 = scmp.lt.s32.totalorder (!%p134_p3), %s429_s9, 1 }
   0x7   : > { %137 = sbr.rel (%p134_p3) target bundleno = 134 (0x86), region = 28 }
   0xc   : > { %v262_v0 = vld [vmem:[%s508_s1] sm:$0xf]  ;;  %v439_v1 = vmov 0   ;;  %s515_s9 = smov (!%p164_p4, %s429_s9), 1  ;;  %vm191_vm0 = vcmask 1043456  }
   0xd   : > { %406 = vset.pattern.permute.xlu0 %v439_v1  ;;  %s378_s15 = sshll.u32 %s515_s9, 3  ;;  %v440_v62 = vmov 839922192  }
   0xe   : > { %271 = vperm.xlu0 %406, %v262_v0   ;;  %s171_s18 = scalar_lea.vmem %s507_s0, %s378_s15  ;;  %v274_v63 = vunpack.c.l.s4 %v440_v62  ;;  %s181_s21 = scalar_lea.vmem %s509_s2, %s378_s15 }
   0xf   : > { %v485_v2 = vld [vmem:[%s171_s18] sm:$0xff] }
  0x10   : > { %v184_v3 = vmul.f32 %v485_v2, %v485_v2 }
  0x12   : > { %186 = vst [vmem:[#allocation1] ss:$2 sm:$0xff] %v184_v3  ;;  %v275_v3 = vunpack.c.0.s8 %v274_v63 }
  0x19   : > { %v188_v4 = vld.sshfl [vmem:[#allocation1 + $0x8] sm:$0xff pattern:$0x75316420]  ;;  %v187_v6 = vld.sshfl [vmem:[#allocation1] sm:$0xff pattern:$0x75316420] }
  0x1a   : > { %v199_v5 = vsel %vm191_vm0, %v188_v4, 0.0  ;;  %v192_v8 = vsel %vm191_vm0, %v187_v6, 0.0 }
  0x1b   : > { %v200_v7 = vrot.slane %v199_v5, 4  ;;  %v193_v9 = vrot.slane %v192_v8, 4 }
  0x1d   : > { %v201_v10 = vadd.f32 %v200_v7, %v199_v5  ;;  %v194_v11 = vadd.f32 %v193_v9, %v192_v8 }
  0x1f   : > { %v202_v12 = vrot.slane %v201_v10, 2  ;;  %v195_v13 = vrot.slane %v194_v11, 2 }
  0x21   : > { %v203_v14 = vadd.f32 %v202_v12, %v201_v10  ;;  %v196_v15 = vadd.f32 %v195_v13, %v194_v11 }
  0x23   : > { %v204_v16 = vrot.slane %v203_v14, 1  ;;  %v197_v17 = vrot.slane %v196_v15, 1 }
  0x25   : > { %v205_v18 = vadd.f32 %v204_v16, %v203_v14  ;;  %v198_v19 = vadd.f32 %v197_v17, %v196_v15 }
  0x27   : > { %407 = vrsqrt.f32 %v205_v18  ;;  %vm225_vm1 = vcmp.eq.f32.partialorder %v205_v18, inf  ;;  %v228_v33 = vand.u32 2147483648, %v205_v18  ;;  %vm227_vm2 = vcmp.eq.f32.partialorder %v205_v18, 0.0 }
  0x28   : > { %409 = vrsqrt.f32 %v198_v19  ;;  %vm213_vm3 = vcmp.eq.f32.partialorder %v198_v19, inf  ;;  %v216_v36 = vand.u32 2147483648, %v198_v19  ;;  %vm215_vm4 = vcmp.eq.f32.partialorder %v198_v19, 0.0 }
  0x2d   : > { %v408_v20 = vpop.eup %407 }
  0x2e   : > { %v219_v21 = vmul.f32 %v408_v20, %v205_v18  ;;  %v410_v22 = vpop.eup %409 }
  0x2f   : > { %v207_v23 = vmul.f32 %v410_v22, %v198_v19 }
  0x30   : > { %v220_v24 = vmul.f32 %v408_v20, %v219_v21 }
  0x31   : > { %v208_v25 = vmul.f32 %v410_v22, %v207_v23 }
  0x32   : > { %v221_v26 = vmul.f32 0.5, %v220_v24 }
  0x33   : > { %v209_v27 = vmul.f32 0.5, %v208_v25 }
  0x34   : > { %v222_v28 = vsub.f32 1.5, %v221_v26 }
  0x35   : > { %v210_v29 = vsub.f32 1.5, %v209_v27 }
  0x36   : > { %v223_v30 = vmul.f32 %v408_v20, %v222_v28 }
  0x37   : > { %v211_v31 = vmul.f32 %v410_v22, %v210_v29 }
  0x38   : > { %v224_v32 = vmul.f32 %v223_v30, %v205_v18 }
  0x39   : > { %v212_v34 = vmul.f32 %v211_v31, %v198_v19 }
  0x3a   : > { %v226_v35 = vsel %vm225_vm1, %v205_v18, %v224_v32 }
  0x3b   : > { %v229_v37 = vsel %vm227_vm2, %v228_v33, %v226_v35  ;;  %v214_v38 = vsel %vm213_vm3, %v198_v19, %v212_v34 }
  0x3c   : > { %v231_v39 = vadd.f32 1e-10, %v229_v37  ;;  %v217_v40 = vsel %vm215_vm4, %v216_v36, %v214_v38 }
  0x3d   : > { %v230_v41 = vadd.f32 1e-10, %v217_v40 }
  0x3e   : > { %411 = vrcp.f32 %v231_v39  ;;  %vm252_vm5 = vweird.f32 %v231_v39  ;;  %v258_v49 = vand.u32 2147483648, %v231_v39  ;;  %v256_v52 = vand.u32 2147483647, %v231_v39 }
  0x3f   : > { %413 = vrcp.f32 %v230_v41  ;;  %vm237_vm8 = vweird.f32 %v230_v41  ;;  %v243_v53 = vand.u32 2147483648, %v230_v41  ;;  %v241_v56 = vand.u32 2147483647, %v230_v41 }
  0x40   : > { %v259_v54 = vor.u32 1.1754944e-38, %v258_v49  ;;  %vm257_vm10 = vcmp.eq.f32.partialorder %v256_v52, 8.507059e+37 }
  0x41   : > { %v244_v58 = vor.u32 1.1754944e-38, %v243_v53  ;;  %vm242_vm12 = vcmp.eq.f32.partialorder %v241_v56, 8.507059e+37 }
  0x44   : > { %v412_v42 = vpop.eup %411 }
  0x45   : > { %v248_v43 = vmul.f32 %v412_v42, %v231_v39  ;;  %v414_v44 = vpop.eup %413  ;;  %vm253_vm6 = vweird.f32 %v412_v42 }
  0x46   : > { %v233_v45 = vmul.f32 %v414_v44, %v230_v41  ;;  %vm254_vm7 = vmor %vm252_vm5, %vm253_vm6  ;;  %vm238_vm9 = vweird.f32 %v414_v44 }
  0x47   : > { %v249_v46 = vsub.f32 1.0, %v248_v43  ;;  %vm239_vm11 = vmor %vm237_vm8, %vm238_vm9 }
  0x48   : > { %v234_v47 = vsub.f32 1.0, %v233_v45 }
  0x49   : > { %v250_v48 = vmul.f32 %v412_v42, %v249_v46 }
  0x4a   : > { %v235_v50 = vmul.f32 %v414_v44, %v234_v47 }
  0x4b   : > { %v251_v51 = vadd.f32 %v412_v42, %v250_v48 }
  0x4c   : > { %v236_v55 = vadd.f32 %v414_v44, %v235_v50 }
  0x4d   : > { %v255_v57 = vsel %vm254_vm7, %v412_v42, %v251_v51 }
  0x4e   : > { %v260_v59 = vsel %vm257_vm10, %v259_v54, %v255_v57  ;;  %v240_v60 = vsel %vm239_vm11, %v414_v44, %v236_v55 }
  0x4f   : > { %v265_v61 = vrot.slane %v260_v59, 4  ;;  %v245_v0 = vsel %vm242_vm12, %v244_v58, %v240_v60 }
  0x51   : > { %v266_v1 = vsel %vm191_vm0, %v245_v0, %v265_v61 }
  0x52   : > { %v268_v4 = vmul.f32 %v266_v1, %v485_v2 }
  0x80   : > { %v272_v5 = vpop.permute.xlu0 %271 }
  0x81   : > { %v276_v6 = vperm.slane %v272_v5, %v275_v3 }
  0x83   : > { %v278_v7 = vmul.f32 %v276_v6, %v268_v4 }
  0x85   : > { %279 = vst [vmem:[%s181_s21] sm:$0xff] %v278_v7 }
  0x86 PF: > { %s12_s11 = sadd.s32 1, %s437_s11   ;;  %s510_s9 = smov %s433_s10 }
  0x87   : > { %p9_p5 = scmp.ge.s32.totalorder %s12_s11, 4   ;;  %s511_s10 = smov %s513_s12 }
  0x89   :  { %11 = sbr.rel (!%p9_p5) target bundleno = 2 (0x2), region = 58 }

</bundles_post_ra>
